<compile_context>
chip_gen: v5e
topology: v5e:2x2
jax: 0.10.0
libtpu: 0.0.40
codegen_flags: <defaults>
</compile_context>

<pallas_src>
import math

import jax
import jax.numpy as jnp
from jax.experimental import pallas as pl
from jax.experimental.pallas import tpu as pltpu


# ---- tuning constants -------------------------------------------------------
_VMEM_CAP_BYTES = 48 << 20     # stay well under v7x's 64 MiB physical VMEM
_VMEM_SLACK_BYTES = 4 << 20    # headroom for Mosaic internal scratch / sems
_MIN_GRID_STEPS = 4            # let v7x's 2 TensorCores each get >= 2 steps


def _mulvector_kernel(x_ref, lam_ref, o_ref):
    # x_ref: (tile_rows, lane); lam_ref: (1, lane) resident across grid steps.
    o_ref[...] = x_ref[...].astype(o_ref.dtype) * lam_ref[...]


def _lcm(a: int, b: int) -> int:
    return a * b // math.gcd(a, b)


def _choose_layout(total: int, vec_dim: int):
    """Pick (lane_width, rows) for a flattened (rows, lane_width) view.

    lane_width is a multiple of both vec_dim (so a tiled lamda broadcasts
    correctly) and 128 (lane-dense stores).  Returns None if no lane-dense
    layout exists -- caller should fall back to the plain XLA multiply.
    """
    base = _lcm(vec_dim, 128)
    if total % base != 0:
        return None
    lane = base
    for mult in (8, 4, 2):            # widen lanes while it still divides total
        cand = base * mult
        if cand <= 1024 and total % cand == 0:
            lane = cand
            break
    return lane, total // lane


def _align_down(v: int, m: int) -> int:
    return max(m, (v // m) * m)


def _choose_tile_rows(rows: int, lane: int, in_itemsize: int, out_itemsize: int,
                      sublane: int, target_bytes: int) -> int:
    """Row tile sized by bytes, clamped by the VMEM budget and a minimum grid
    step count, respecting the (8,128) block-shape rule."""
    itemsize = max(in_itemsize, out_itemsize)
    # Per-block byte target.
    max_rows_target = max(sublane, target_bytes // max(1, lane * itemsize))
    # Double-buffered in+out blocks must fit under the VMEM cap minus slack.
    per_row_vmem = 2 * lane * (in_itemsize + out_itemsize)
    max_rows_vmem = max(sublane,
                        (_VMEM_CAP_BYTES - _VMEM_SLACK_BYTES) // per_row_vmem)
    # Prefer >= _MIN_GRID_STEPS grid steps when rows are plentiful (v7x cores).
    max_rows_steps = rows
    if rows >= _MIN_GRID_STEPS * sublane:
        max_rows_steps = _align_down(-(-rows // _MIN_GRID_STEPS), sublane)
    max_rows = min(max_rows_target, max_rows_vmem, max_rows_steps)

    if rows <= max_rows:
        return rows                    # full extent along rows: always legal
    tr = _align_down(max_rows, sublane)
    # Prefer a divisor of rows that is a multiple of `sublane` (clean grid).
    t = tr
    while t >= sublane:
        if rows % t == 0:
            return t
        t -= sublane
    # No clean divisor: sublane-aligned tile with a ragged edge block
    # (Pallas drops the out-of-bounds writeback of the last block; the
    # padded reads only feed dropped lanes -- fine for elementwise).
    return tr


def mulvector(x: jax.Array, lamda: jax.Array, *,
              use_pallas: bool | None = None,
              target_block_bytes: int = 8 << 20) -> jax.Array:
    """out = x * lamda, broadcasting lamda over the last axis of x."""
    assert lamda.ndim == 1, "lamda must be a vector"
    vec_dim = lamda.shape[0]
    assert x.shape[-1] == vec_dim, "lamda must match the last dim of x"

    out_dtype = jnp.promote_types(x.dtype, lamda.dtype)

    def _xla_path():
        return x.astype(out_dtype) * lamda.astype(out_dtype)

    if use_pallas is False:
        return _xla_path()

    total = int(x.size)
    total_bytes = total * jnp.dtype(x.dtype).itemsize
    if use_pallas is None:
        # A standalone elementwise pallas_call can at best tie XLA's fused
        # broadcast multiply and prevents fusion with producers/consumers,
        # so only auto-opt-in for large inputs.
        use_pallas = total_bytes >= (8 << 20)

    layout = _choose_layout(total, vec_dim)
    if (not use_pallas) or layout is None:
        # Non-lane-dense last dim (not foldable to a multiple of 128) would
        # force masked vst.msk partial stores; XLA hits roofline here anyway.
        return _xla_path()

    orig_shape = x.shape
    lane, rows = layout
    x2d = x.reshape(rows, lane)
    lam2d = jnp.tile(lamda.astype(out_dtype), lane // vec_dim).reshape(1, lane)

    in_itemsize = jnp.dtype(x.dtype).itemsize
    out_itemsize = jnp.dtype(out_dtype).itemsize
    sublane = {4: 8, 2: 16, 1: 32}.get(in_itemsize, 8)
    tr = _choose_tile_rows(rows, lane, in_itemsize, out_itemsize,
                           sublane, target_block_bytes)
    grid = (pl.cdiv(rows, tr),)

    # Honest VMEM limit: double-buffered in+out blocks + resident lamda + slack.
    in_block = tr * lane * in_itemsize
    out_block = tr * lane * out_itemsize
    footprint = 2 * (in_block + out_block) + 2 * lane * out_itemsize
    vmem_limit = int(min(footprint + _VMEM_SLACK_BYTES, _VMEM_CAP_BYTES))

    cost = pl.CostEstimate(
        flops=rows * lane,
        transcendentals=0,
        bytes_accessed=rows * lane * (in_itemsize + out_itemsize)
        + lane * out_itemsize,
    )

    out2d = pl.pallas_call(
        _mulvector_kernel,
        out_shape=jax.ShapeDtypeStruct((rows, lane), out_dtype),
        grid_spec=pltpu.PrefetchScalarGridSpec(
            num_scalar_prefetch=0,
            grid=grid,
            in_specs=[
                pl.BlockSpec((tr, lane), lambda i: (i, 0)),
                pl.BlockSpec((1, lane), lambda i: (0, 0)),  # lamda stays resident
            ],
            out_specs=pl.BlockSpec((tr, lane), lambda i: (i, 0)),
        ),
        compiler_params=pltpu.CompilerParams(
            dimension_semantics=("parallel",),
            vmem_limit_bytes=vmem_limit,
        ),
        cost_estimate=cost,
    )(x2d, lam2d)

    return out2d.reshape(orig_shape)


if __name__ == "__main__":
    key = jax.random.PRNGKey(0)
    k0, k1, k2, k3 = jax.random.split(key, 4)

    # --- Main example: NCHW-style input, vec_dim == W (matches the module). ---
    N, C, H, W = 2, 4, 16, 16
    x = jax.random.normal(k0, (N, C, H, W), dtype=jnp.float32)
    lamda = jnp.ones((W,), dtype=jnp.float32)  # nn.Parameter(torch.ones(vec_dim))

    out = mulvector(x, lamda, use_pallas=True)  # force the Pallas path
    out = jax.block_until_ready(out)
    ref = x * lamda
    assert out.shape == x.shape and out.dtype == ref.dtype
    assert jnp.allclose(out, ref, atol=1e-6), "mismatch vs reference (main)"

    # --- Non-128-friendly vec_dim: now routed to the fused XLA path. ---
    x2 = jax.random.normal(k1, (2, 3, 8, 12), dtype=jnp.float32)
    lam2 = jax.random.normal(k2, (12,), dtype=jnp.float32)
    out2 = jax.block_until_ready(mulvector(x2, lam2, use_pallas=True))
    assert jnp.allclose(out2, x2 * lam2, atol=1e-6), "mismatch vs reference (xla fallback)"

    # --- Multi-step grid (tiny target block forces >1 grid step) + resident lamda. ---
    x3 = jax.random.normal(k3, (4, 8, 32, 16), dtype=jnp.float32)
    out3 = jax.block_until_ready(
        mulvector(x3, lamda, use_pallas=True, target_block_bytes=4096))
    assert jnp.allclose(out3, x3 * lamda, atol=1e-6), "mismatch vs reference (grid)"

    # --- bf16 x with f32 lamda: PyTorch-style promotion to f32. ---
    xb = x.astype(jnp.bfloat16)
    outb = jax.block_until_ready(mulvector(xb, lamda, use_pallas=True))
    assert outb.dtype == jnp.float32
    assert jnp.allclose(outb, xb.astype(jnp.float32) * lamda, atol=1e-6)

    # --- Auto path: tiny input falls back to fused XLA multiply. ---
    out_auto = jax.block_until_ready(mulvector(x, lamda))
    assert jnp.allclose(out_auto, ref, atol=1e-6)

    print("KERNEL_OK")
</pallas_src>

<mosaic_0001>
module attributes {stable_mosaic.version = 11 : i64} {
  func.func @_mulvector_kernel(%arg0: i32, %arg1: memref<2x1024xf32, #tpu.memory_space<vmem>>, %arg2: memref<1x1024xf32, #tpu.memory_space<vmem>>, %arg3: memref<2x1024xf32, #tpu.memory_space<vmem>>) attributes {dimension_semantics = [#tpu.dimension_semantics<parallel>], iteration_bounds = array<i64: 1>, scalar_prefetch = 0 : i64, scratch_operands = 0 : i64, tpu.core_type = #tpu.core_type<tc>, window_params = [{transform_indices = @transform_0, window_bounds = array<i64: 2, 1024>}, {pipeline_mode = #tpu.pipeline_mode<synchronous>, transform_indices = @transform_1, window_bounds = array<i64: 1, 1024>}, {transform_indices = @transform_2, window_bounds = array<i64: 2, 1024>}]} {
    %c0 = arith.constant 0 : index
    %c0_0 = arith.constant 0 : index
    %0 = vector.load %arg1[%c0, %c0_0] : memref<2x1024xf32, #tpu.memory_space<vmem>>, vector<2x1024xf32>
    %c0_1 = arith.constant 0 : index
    %c0_2 = arith.constant 0 : index
    %1 = vector.load %arg2[%c0_1, %c0_2] : memref<1x1024xf32, #tpu.memory_space<vmem>>, vector<1x1024xf32>
    %2 = vector.broadcast %1 : vector<1x1024xf32> to vector<2x1024xf32>
    %3 = arith.mulf %0, %2 : vector<2x1024xf32>
    %c0_3 = arith.constant 0 : index
    %c0_4 = arith.constant 0 : index
    %4 = vector.load %arg3[%c0_3, %c0_4] : memref<2x1024xf32, #tpu.memory_space<vmem>>, vector<2x1024xf32>
    tpu.vector_store %arg3[%c0_3, %c0_4], %3 {strides = array<i32>} : memref<2x1024xf32, #tpu.memory_space<vmem>>, vector<2x1024xf32>,
    return
  }
  func.func @transform_0(%arg0: i32) -> (i32, i32) {
    %c0_i32 = arith.constant 0 : i32
    %c0_i32_0 = arith.constant 0 : i32
    return %arg0, %c0_i32 : i32, i32
  }
  func.func @transform_1(%arg0: i32) -> (i32, i32) {
    %c0_i32 = arith.constant 0 : i32
    %c0_i32_0 = arith.constant 0 : i32
    %c0_i32_1 = arith.constant 0 : i32
    return %c0_i32, %c0_i32_0 : i32, i32
  }
  func.func @transform_2(%arg0: i32) -> (i32, i32) {
    %c0_i32 = arith.constant 0 : i32
    %c0_i32_0 = arith.constant 0 : i32
    return %arg0, %c0_i32 : i32, i32
  }
}

</mosaic_0001>

<bundles_post_ra>
// kernel: tpu_custom_call.1
= control target key start
LH: loop header
LB: loop body
LE: loop exit
PB: predicated region body
PF: predicated region fallthrough
CT: control target
= control target key end

     0   :  { %7 = vsyncpa [#allocation3], 0  ;;  %s203_s0 = inlined_call_operand.hbm [shape: f32[2,1024], index: 0, kind: input, shape index: {}]   ;;  %s204_s1 = inlined_call_operand.hbm [shape: f32[1,1024], index: 1, kind: input, shape index: {}]   ;;  %s205_s2 = inlined_call_operand.hbm [shape: f32[2,1024], index: 2, kind: output, shape index: {}]  }
   0x1   :  { %8 = vsyncpa [#allocation6], 0 }
   0x2   :  { %9 = vsyncpa [#allocation4], 0  ;;  %s15_s11 = sshll.u32 %s203_s0, 4  ;;  %s172_s12 = smov [#allocation2]   ;;  %s16_s11 = int_to_ptr.hbm [resolvable:$true] %s15_s11 }
   0x3   :  { %s17_s13 = sshll.u32 %s172_s12, 4  ;;  %s26_s16 = sshll.u32 %s204_s1, 4  ;;  %s18_s13 = int_to_ptr.vmem [resolvable:$true] %s17_s13  ;;  %s27_s16 = int_to_ptr.hbm [resolvable:$true] %s26_s16 }
   0x4   :  { %20 = dma.hbm_to_vmem [thread:$0]  %s16_s11, 256, %s18_s13, [#allocation3]  }
   0x5   :  { %s173_s17 = smov [#allocation5]  }
   0x6   :  { %s28_s18 = sshll.u32 %s173_s17, 4  ;;  %s29_s18 = int_to_ptr.vmem [resolvable:$true] %s28_s18 }
   0x7   :  { %31 = dma.hbm_to_vmem [thread:$0]  %s27_s16, 128, %s29_s18, [#allocation6]  }
   0x8   :  { %166 = dma.done.wait [#allocation3], 256  }
   0x9   :  { %167 = vsyncadd [#allocation3], 4294967040 }
   0xa   :  { %168 = dma.done.wait [#allocation6], 128  }
   0xb   :  { %169 = vsyncadd [#allocation6], 4294967168  ;;  %v42_v0 = vld [vmem:[#allocation5] sm:$0xff]  ;;  %vm58_vm0 = vcmask 1041408   ;;  %vm60_vm1 = vcmask 1045508   ;;  %vm62_vm2 = vcmask 1043456  }
   0xc   :  { %v44_v1 = vperm.slane %v42_v0, 0  ;;  %v45_v2 = vperm.slane %v42_v0, 1  ;;  %v46_v3 = vperm.slane %v42_v0, 2  ;;  %v47_v4 = vperm.slane %v42_v0, 3  ;;  %v40_v12 = vld [vmem:[#allocation2] sm:$0xff]  ;;  %v41_v18 = vld [vmem:[#allocation2 + $0x8] sm:$0xff] }
   0xd   :  { %v48_v5 = vperm.slane %v42_v0, 4  ;;  %v49_v6 = vperm.slane %v42_v0, 5  ;;  %v50_v7 = vperm.slane %v42_v0, 6  ;;  %v51_v8 = vperm.slane %v42_v0, 7  ;;  %s174_s0 = smov [#allocation7]   ;;  %s80_s21 = sshll.u32 %s205_s2, 4  ;;  %s81_s21 = int_to_ptr.hbm [resolvable:$true] %s80_s21 }
   0xe   :  { %v52_v9 = vrot.slane %v45_v2, 6  ;;  %v53_v10 = vrot.slane %v46_v3, 4  ;;  %v54_v11 = vrot.slane %v47_v4, 2  ;;  %s78_s1 = sshll.u32 %s174_s0, 4  ;;  %s79_s1 = int_to_ptr.vmem [resolvable:$true] %s78_s1 }
   0xf   :  { %v55_v13 = vrot.slane %v49_v6, 6  ;;  %v56_v14 = vrot.slane %v50_v7, 4  ;;  %v57_v15 = vrot.slane %v51_v8, 2 }
  0x10   :  { %v59_v16 = vsel %vm58_vm0, %v44_v1, %v52_v9  ;;  %v61_v17 = vsel %vm60_vm1, %v53_v10, %v54_v11 }
  0x11   :  { %v63_v19 = vsel %vm62_vm2, %v59_v16, %v61_v17  ;;  %v64_v20 = vsel %vm58_vm0, %v48_v5, %v55_v13  ;;  %v65_v21 = vsel %vm60_vm1, %v56_v14, %v57_v15 }
  0x12   :  { %v69_v22 = vmul.f32 %v63_v19, %v40_v12  ;;  %v66_v23 = vsel %vm62_vm2, %v64_v20, %v65_v21 }
  0x13   :  { %v70_v24 = vmul.f32 %v66_v23, %v41_v18 }
  0x14   :  { %71 = vst [vmem:[#allocation7] sm:$0xff] %v69_v22 }
  0x15   :  { %72 = vst [vmem:[#allocation7 + $0x8] sm:$0xff] %v70_v24 }
  0x16   :  { %83 = dma.vmem_to_hbm [thread:$0]  %s79_s1, 256, %s81_s21, [#allocation4]  }
  0x17   :  { %170 = dma.done.wait [#allocation4], 256  }
  0x18   :  { %171 = vsyncadd [#allocation4], 4294967040 }
  0x19   :  { %88 = vsyncpa [#allocation3], 1 }
  0x1a   :  { %89 = vsyncpa [#allocation6], 1 }
  0x1b   :  { %90 = vsyncpa [#allocation4], 1 }

</bundles_post_ra>
